<compile_context>
chip_gen: v6e
topology: v6e:2x2x1
jax: 0.10.0
libtpu: 0.0.40
codegen_flags: <defaults>
</compile_context>

<pallas_src>
import math

import jax
import jax.numpy as jnp
from jax.experimental import pallas as pl
from jax.experimental.pallas import tpu as pltpu


def _copy_kernel(x_ref, o_ref):
    # Pure tile-for-tile move; identical block shapes, no relayout.
    o_ref[...] = x_ref[...]


_LANE_CAP_ELEMS = 8192                 # max last-dim (lane) width per block
_DEFAULT_BLOCK_BYTES = 4 * 1024 * 1024  # ~4 MiB slabs


def _pick_lane_width(total_elems):
    """Largest multiple-of-128 divisor of total_elems, capped at _LANE_CAP_ELEMS."""
    top = min(_LANE_CAP_ELEMS, total_elems) // 128
    for m in range(top, 0, -1):
        cand = m * 128
        if total_elems % cand == 0:
            return cand
    return None


def _pick_rows(n_rows, lane_elems, itemsize, block_bytes):
    """Rows per block: largest divisor of n_rows fitting the VMEM budget.

    Preference: sublane-aligned (mult of 8) with >=2 grid steps > sublane-
    aligned > full dim (always layout-legal) > >=2 steps > anything that fits.
    """
    row_bytes = max(1, lane_elems * itemsize)
    max_rows = max(1, block_bytes // row_bytes)
    divisors = [d for d in range(1, n_rows + 1) if n_rows % d == 0]

    def pick(*preds):
        cands = [d for d in divisors if d <= max_rows and all(p(d) for p in preds)]
        return max(cands) if cands else None

    return (
        pick(lambda d: d % 8 == 0, lambda d: n_rows // d >= 2)
        or pick(lambda d: d % 8 == 0)
        or pick(lambda d: d == n_rows)
        or pick(lambda d: n_rows // d >= 2)
        or pick()
        or 1
    )


def merge_temporal_dim(x_seq: jax.Array, *, target_block_bytes: int = _DEFAULT_BLOCK_BYTES) -> jax.Array:
    """Pallas equivalent of MergeTemporalDim.forward: x_seq.flatten(0, 1)."""
    T, B = x_seq.shape[0], x_seq.shape[1]
    rest = x_seq.shape[2:]
    out_shape = (T * B,) + rest

    total_elems = math.prod(x_seq.shape)
    itemsize = jnp.dtype(x_seq.dtype).itemsize

    # Free choice of 2-D factorization (bytes are identical either way).
    lane = _pick_lane_width(total_elems)
    if lane is None:
        # Odd total size: fall back to the natural (T*B, prod(rest)) layout;
        # the last dim is then the full array dim, which is always legal.
        # TODO(synk): lane-tile here too if prod(rest) ever exceeds the VMEM budget.
        lane = max(1, math.prod(rest) if rest else 1)
    n_rows = total_elems // lane

    x2 = x_seq.reshape(n_rows, lane)   # metadata-only view

    rows = _pick_rows(n_rows, lane, itemsize, target_block_bytes)
    grid = (n_rows // rows,)

    out2 = pl.pallas_call(
        _copy_kernel,
        grid=grid,
        in_specs=[pl.BlockSpec((rows, lane), lambda i: (i, 0))],
        out_specs=pl.BlockSpec((rows, lane), lambda i: (i, 0)),
        out_shape=jax.ShapeDtypeStruct((n_rows, lane), x_seq.dtype),
        compiler_params=pltpu.CompilerParams(
            dimension_semantics=("parallel",),   # megacore split on v7x; no-op on v5e/v6e
            vmem_limit_bytes=32 * 1024 * 1024,   # safe on v5e/v6e/v7x; >> 4x block budget
        ),
    )(x2)

    return out2.reshape(out_shape)


if __name__ == "__main__":
    key = jax.random.PRNGKey(0)
    T, B, C, H, W = 8, 2, 4, 16, 16  # small shapes: seq=8, batch=2, NCHW frames
    x_seq = jax.random.normal(key, (T, B, C, H, W), dtype=jnp.float32)

    out = merge_temporal_dim(x_seq)
    out = jax.block_until_ready(out)

    # Reference: plain reshape (== torch flatten(0,1) semantics).
    ref = x_seq.reshape(T * B, C, H, W)
    assert out.shape == (T * B, C, H, W), out.shape
    assert out.dtype == x_seq.dtype
    assert bool(jnp.array_equal(out, ref)), "mismatch vs reference flatten"

    print("KERNEL_OK")
</pallas_src>

<mosaic_0001>
module attributes {stable_mosaic.version = 11 : i64} {
  func.func @_copy_kernel(%arg0: i32, %arg1: memref<2x8192xf32, #tpu.memory_space<vmem>>, %arg2: memref<2x8192xf32, #tpu.memory_space<vmem>>) attributes {dimension_semantics = [#tpu.dimension_semantics<parallel>], iteration_bounds = array<i64: 1>, scalar_prefetch = 0 : i64, scratch_operands = 0 : i64, tpu.core_type = #tpu.core_type<tc>, window_params = [{transform_indices = @transform_0, window_bounds = array<i64: 2, 8192>}, {transform_indices = @transform_1, window_bounds = array<i64: 2, 8192>}]} {
    %c0 = arith.constant 0 : index
    %c0_0 = arith.constant 0 : index
    %0 = vector.load %arg1[%c0, %c0_0] : memref<2x8192xf32, #tpu.memory_space<vmem>>, vector<2x8192xf32>
    %c0_1 = arith.constant 0 : index
    %c0_2 = arith.constant 0 : index
    %1 = vector.load %arg2[%c0_1, %c0_2] : memref<2x8192xf32, #tpu.memory_space<vmem>>, vector<2x8192xf32>
    tpu.vector_store %arg2[%c0_1, %c0_2], %0 {strides = array<i32>} : memref<2x8192xf32, #tpu.memory_space<vmem>>, vector<2x8192xf32>,
    return
  }
  func.func @transform_0(%arg0: i32) -> (i32, i32) {
    %c0_i32 = arith.constant 0 : i32
    %c0_i32_0 = arith.constant 0 : i32
    return %arg0, %c0_i32 : i32, i32
  }
  func.func @transform_1(%arg0: i32) -> (i32, i32) {
    %c0_i32 = arith.constant 0 : i32
    %c0_i32_0 = arith.constant 0 : i32
    return %arg0, %c0_i32 : i32, i32
  }
}

</mosaic_0001>

<bundles_post_ra>
// kernel: tpu_custom_call.1
= control target key start
LH: loop header
LB: loop body
LE: loop exit
PB: predicated region body
PF: predicated region fallthrough
CT: control target
= control target key end

     0   :  { %6 = vsyncpa [#allocation3], 0  ;;  %s132_s0 = inlined_call_operand.hbm [shape: f32[2,8192], index: 0, kind: input, shape index: {}]   ;;  %s133_s1 = inlined_call_operand.hbm [shape: f32[2,8192], index: 1, kind: output, shape index: {}]  }
   0x1   :  { %7 = vsyncpa [#allocation4], 0  ;;  %s114_s6 = smov [#allocation2]  }
   0x2   :  { %s14_s7 = sshll.u32 %s114_s6, 4  ;;  %s15_s7 = int_to_ptr.vmem [resolvable:$true] %s14_s7 }
   0x3   :  { %s78_s8 = scalar_lea.vmem %s15_s7, 2048  ;;  %p83_p1 = scmp.lt.s32.totalorder %s15_s7, %s15_s7 }
   0x4   :  { %p79_p0 = scmp.ne.s32.totalorder %s15_s7, %s78_s8  ;;  %p84_p2 = scmp.lt.s32.totalorder %s78_s8, %s78_s8 }
   0x6   :  { %p85_p3 = por %p84_p2, %p83_p1 }
   0x8   :  { %p86_p4 = pnand %p85_p3, %p79_p0 }
   0xa   :  { %89 = shalt.err (!%p86_p4)
}
   0xb   :  { %17 = dma.hbm_to_vmem [thread:$0]  %s132_s0, 2048, %s15_s7, [#allocation3]  }
   0xc   :  { %110 = dma.done.wait [#allocation3], 2048  }
   0xd   :  { %111 = vsyncadd [#allocation3], 4294965248  ;;  %v21_v0 = vld [vmem:[#allocation2] sm:$0xff]  ;;  %v22_v1 = vld [vmem:[#allocation2 + $0x8] sm:$0xff]  ;;  %s115_s11 = smov [#allocation5]  }
   0xe   :  { %v23_v2 = vld [vmem:[#allocation2 + $0x10] sm:$0xff]  ;;  %37 = vst [vmem:[#allocation5] sm:$0xff] %v21_v0  ;;  %38 = vst [vmem:[#allocation5 + $0x8] sm:$0xff] %v22_v1  ;;  %v24_v3 = vld [vmem:[#allocation2 + $0x18] sm:$0xff]  ;;  %s59_s12 = sshll.u32 %s115_s11, 4  ;;  %s60_s12 = int_to_ptr.vmem [resolvable:$true] %s59_s12 }
   0xf   :  { %39 = vst [vmem:[#allocation5 + $0x10] sm:$0xff] %v23_v2  ;;  %v25_v4 = vld [vmem:[#allocation2 + $0x20] sm:$0xff]  ;;  %v26_v5 = vld [vmem:[#allocation2 + $0x28] sm:$0xff]  ;;  %40 = vst [vmem:[#allocation5 + $0x18] sm:$0xff] %v24_v3  ;;  %s90_s0 = scalar_lea.vmem %s60_s12, 2048  ;;  %p95_p6 = scmp.lt.s32.totalorder %s60_s12, %s60_s12 }
  0x10   :  { %41 = vst [vmem:[#allocation5 + $0x20] sm:$0xff] %v25_v4  ;;  %42 = vst [vmem:[#allocation5 + $0x28] sm:$0xff] %v26_v5  ;;  %v27_v6 = vld [vmem:[#allocation2 + $0x30] sm:$0xff]  ;;  %v28_v7 = vld [vmem:[#allocation2 + $0x38] sm:$0xff]  ;;  %p91_p5 = scmp.ne.s32.totalorder %s60_s12, %s90_s0  ;;  %p96_p7 = scmp.lt.s32.totalorder %s90_s0, %s90_s0 }
  0x11   :  { %v29_v8 = vld [vmem:[#allocation2 + $0x40] sm:$0xff]  ;;  %43 = vst [vmem:[#allocation5 + $0x30] sm:$0xff] %v27_v6  ;;  %44 = vst [vmem:[#allocation5 + $0x38] sm:$0xff] %v28_v7  ;;  %v30_v9 = vld [vmem:[#allocation2 + $0x48] sm:$0xff] }
  0x12   :  { %45 = vst [vmem:[#allocation5 + $0x40] sm:$0xff] %v29_v8  ;;  %v31_v10 = vld [vmem:[#allocation2 + $0x50] sm:$0xff]  ;;  %v32_v11 = vld [vmem:[#allocation2 + $0x58] sm:$0xff]  ;;  %46 = vst [vmem:[#allocation5 + $0x48] sm:$0xff] %v30_v9  ;;  %p97_p8 = por %p96_p7, %p95_p6 }
  0x13   :  { %47 = vst [vmem:[#allocation5 + $0x50] sm:$0xff] %v31_v10  ;;  %48 = vst [vmem:[#allocation5 + $0x58] sm:$0xff] %v32_v11  ;;  %v33_v12 = vld [vmem:[#allocation2 + $0x60] sm:$0xff]  ;;  %v34_v13 = vld [vmem:[#allocation2 + $0x68] sm:$0xff] }
  0x14   :  { %v35_v14 = vld [vmem:[#allocation2 + $0x70] sm:$0xff]  ;;  %49 = vst [vmem:[#allocation5 + $0x60] sm:$0xff] %v33_v12  ;;  %50 = vst [vmem:[#allocation5 + $0x68] sm:$0xff] %v34_v13  ;;  %v36_v15 = vld [vmem:[#allocation2 + $0x78] sm:$0xff]  ;;  %p98_p9 = pnand %p97_p8, %p91_p5 }
  0x15   :  { %51 = vst [vmem:[#allocation5 + $0x70] sm:$0xff] %v35_v14  ;;  %52 = vst [vmem:[#allocation5 + $0x78] sm:$0xff] %v36_v15 }
  0x16   :  { %101 = shalt.err (!%p98_p9)
}
  0x17   :  { %62 = dma.vmem_to_hbm [thread:$0]  %s60_s12, 2048, %s133_s1, [#allocation4]  }
  0x18   :  { %112 = dma.done.wait [#allocation4], 2048  }
  0x19   :  { %113 = vsyncadd [#allocation4], 4294965248 }
  0x1a   :  { %66 = vsyncpa [#allocation3], 1 }
  0x1b   :  { %67 = vsyncpa [#allocation4], 1 }

</bundles_post_ra>
